<compile_context>
chip_gen: v7x
topology: tpu7x:2x2x1
jax: 0.10.0
libtpu: 0.0.40
codegen_flags: <defaults>
</compile_context>

<pallas_src>
import functools

import jax
import jax.numpy as jnp
from jax.experimental import pallas as pl
from jax.experimental.pallas import tpu as pltpu


INPUT_SIZE = 408
HIDDEN_SIZE = INPUT_SIZE // 2  # 204
NUM_CLASSES = 13


def _round_up(x, m):
    return ((x + m - 1) // m) * m


def classifier_kernel(x_ref, w_ref, b_ref, o_ref):
    # Cast x to the weight dtype (bf16 by default) inside the kernel so the
    # wrapper never re-writes x to HBM just to change dtype.
    x = x_ref[...].astype(w_ref.dtype)
    # Single folded matmul (fc1 and fc2 have no nonlinearity between them):
    #   logits = x @ (W1 @ W2) + (b1 @ W2 + b2), accumulated in f32 on the MXU.
    logits = jnp.dot(x, w_ref[...], preferred_element_type=jnp.float32)
    logits = logits + b_ref[...]   # (1, Cp) f32 bias; padded class columns
                                   # carry -1e30 so exp() underflows to 0.
    # Numerically stable softmax over the lane-dense 128-wide class dim (f32).
    m = jnp.max(logits, axis=1, keepdims=True)
    e = jnp.exp(logits - m)
    # EXACT division (one per row, essentially free): keeps row sums == 1 to
    # f32 precision.  (approx reciprocal previously broke the row-sum check.)
    probs = e / jnp.sum(e, axis=1, keepdims=True)
    # Narrow (TB, num_classes) masked store: ~10x fewer output HBM bytes and
    # no wrapper-side post-slice.  (v5e note: if store-slot bound there,
    # switch back to a 128-lane output block.)
    o_ref[...] = probs[:, : o_ref.shape[-1]].astype(o_ref.dtype)


def prepare_params(w1, b1, w2, b2, compute_dtype=jnp.bfloat16):
    """Fold fc1+fc2 into one affine map, pad classes, cast.  Call ONCE."""
    F, H = w1.shape
    C = w2.shape[1]
    # No activation between fc1 and fc2 in the PyTorch module -> exact fold.
    w_eff = jnp.dot(w1, w2, preferred_element_type=jnp.float32)        # (F, C)
    b_eff = jnp.dot(b1, w2, preferred_element_type=jnp.float32) + b2   # (C,)

    Fp = _round_up(F, 8)        # 408 -> 408: sublane rule only needs % 8 == 0
    Cp = _round_up(C, 128)      # pad classes to one full lane register
    w_p = jnp.zeros((Fp, Cp), compute_dtype).at[:F, :C].set(
        w_eff.astype(compute_dtype))
    # Padded class columns get a huge negative bias -> softmax weight exactly
    # 0.  Bias stays f32 regardless of compute_dtype (softmax math is f32).
    b_p = jnp.full((1, Cp), -1e30, jnp.float32).at[0, :C].set(
        b_eff.astype(jnp.float32))
    return w_p, b_p


def _choose_batch_tiling(B, tb):
    """Return (Bp, TB): padded batch (multiple of 8) and batch tile (mult of 8)."""
    tb = max(8, (tb // 8) * 8)              # block dims must be multiples of 8
    bp8 = _round_up(max(B, 8), 8)
    if bp8 <= tb:
        return bp8, bp8                     # single tile, at most 7 padded rows
    cand = tb
    while bp8 % cand:                       # largest tile <= tb dividing bp8
        cand -= 8
    if cand * 2 >= tb:
        return bp8, cand                    # exact tiling, no extra padding
    # Awkward batch size: pad up to a multiple of tb instead of shrinking the
    # tile (many tiny tiles cost more in ~0.35us/step overhead than < one tile
    # of padded rows costs in HBM/MXU work).
    return _round_up(bp8, tb), tb


@functools.partial(jax.jit, static_argnames=("num_classes", "tb"))
def classifier_forward(x, w_p, b_p, *, num_classes=NUM_CLASSES, tb=1024):
    """x: (B, input_size); w_p: (Fp, Cp) folded weight; b_p: (1, Cp) f32 bias."""
    B, F = x.shape
    Fp, Cp = w_p.shape
    Bp, TB = _choose_batch_tiling(B, tb)

    if Bp != B or Fp != F:
        # Only the batch dim actually pads for this module (F = 408 is already
        # a multiple of 8) -> tiny pad, not a full re-write of x.
        x = jnp.pad(x, ((0, Bp - B), (0, Fp - F)))

    x_item = jnp.dtype(x.dtype).itemsize
    w_item = jnp.dtype(w_p.dtype).itemsize
    cost = pl.CostEstimate(
        flops=2 * Bp * Fp * Cp + 6 * Bp * Cp,
        transcendentals=Bp * Cp,
        bytes_accessed=(Bp * Fp * x_item       # x
                        + Fp * Cp * w_item     # folded weight (VMEM-resident)
                        + 4 * Cp               # bias
                        + 4 * Bp * num_classes),  # narrow output
    )

    out = pl.pallas_call(
        classifier_kernel,
        out_shape=jax.ShapeDtypeStruct((Bp, num_classes), jnp.float32),
        grid=(Bp // TB,),
        in_specs=[
            pl.BlockSpec((TB, Fp), lambda i: (i, 0)),   # x: pipelined over batch
            pl.BlockSpec((Fp, Cp), lambda i: (0, 0)),   # weight: VMEM-resident
            pl.BlockSpec((1, Cp), lambda i: (0, 0)),    # bias:   VMEM-resident
        ],
        out_specs=pl.BlockSpec((TB, num_classes), lambda i: (i, 0)),
        compiler_params=pltpu.CompilerParams(
            # Lets v7x's two TensorCores split the batch grid; harmless on
            # v5e/v6e.  (Verify sharding in the Mosaic dump when tuning.)
            dimension_semantics=("parallel",),
        ),
        cost_estimate=cost,
    )(x, w_p, b_p)

    return out[:B] if Bp != B else out


def init_params(key, input_size=INPUT_SIZE, num_classes=NUM_CLASSES):
    """Deterministic parameter init (PyTorch-Linear-style uniform bounds)."""
    hidden = input_size // 2
    k1, k2, k3, k4 = jax.random.split(key, 4)
    bound1 = 1.0 / (input_size ** 0.5)
    bound2 = 1.0 / (hidden ** 0.5)
    # Stored as (in_features, out_features) -> kernel computes x @ W + b,
    # identical math to nn.Linear's x @ W.T + b.
    w1 = jax.random.uniform(k1, (input_size, hidden), jnp.float32, -bound1, bound1)
    b1 = jax.random.uniform(k2, (hidden,), jnp.float32, -bound1, bound1)
    w2 = jax.random.uniform(k3, (hidden, num_classes), jnp.float32, -bound2, bound2)
    b2 = jax.random.uniform(k4, (num_classes,), jnp.float32, -bound2, bound2)
    return w1, b1, w2, b2


if __name__ == "__main__":
    key = jax.random.PRNGKey(0)
    kx, kp = jax.random.split(key)
    w1, b1, w2, b2 = init_params(kp)

    def reference(x):
        # Unfused two-layer f32 reference (matches the PyTorch forward).
        h = x @ w1 + b1
        return jax.nn.softmax(h @ w2 + b2, axis=1)

    # --- Run 1: default bf16 folded weight, small batch (single tile). ------
    x_small = jax.random.normal(kx, (2, INPUT_SIZE), jnp.float32)
    w_bf16, b_bf16 = prepare_params(w1, b1, w2, b2)             # bf16 default
    out_bf16 = jax.block_until_ready(classifier_forward(x_small, w_bf16, b_bf16))
    ref_small = reference(x_small)
    assert out_bf16.shape == (2, NUM_CLASSES), out_bf16.shape
    # bf16 matmul inputs, f32 accumulation + f32 softmax -> probs within ~1e-3.
    assert jnp.allclose(out_bf16, ref_small, atol=3e-3), \
        float(jnp.max(jnp.abs(out_bf16 - ref_small)))
    # Softmax normalization is exact f32 division -> rows sum to 1 tightly.
    assert jnp.allclose(jnp.sum(out_bf16, axis=1), jnp.ones((2,)), atol=5e-5)

    # --- Run 2: f32 folded weight, multi-tile grid (batch 64, tile 16). -----
    x_big = jax.random.normal(kx, (64, INPUT_SIZE), jnp.float32)
    w_f32, b_f32 = prepare_params(w1, b1, w2, b2, compute_dtype=jnp.float32)
    out_f32 = jax.block_until_ready(classifier_forward(x_big, w_f32, b_f32, tb=16))
    ref_big = reference(x_big)
    assert out_f32.shape == (64, NUM_CLASSES), out_f32.shape
    assert jnp.allclose(out_f32, ref_big, atol=1e-4, rtol=1e-4), \
        float(jnp.max(jnp.abs(out_f32 - ref_big)))
    assert jnp.allclose(jnp.sum(out_f32, axis=1), jnp.ones((64,)), atol=5e-5)

    print("KERNEL_OK")
</pallas_src>

<mosaic_0001>
module attributes {stable_mosaic.version = 11 : i64} {
  func.func @classifier_kernel(%arg0: i32, %arg1: memref<8x408xf32, #tpu.memory_space<vmem>>, %arg2: memref<408x128xbf16, #tpu.memory_space<vmem>>, %arg3: memref<1x128xf32, #tpu.memory_space<vmem>>, %arg4: memref<8x13xf32, #tpu.memory_space<vmem>>) attributes {dimension_semantics = [#tpu.dimension_semantics<parallel>], iteration_bounds = array<i64: 1>, scalar_prefetch = 0 : i64, scratch_operands = 0 : i64, tpu.core_type = #tpu.core_type<tc>, window_params = [{transform_indices = @transform_0, window_bounds = array<i64: 8, 408>}, {pipeline_mode = #tpu.pipeline_mode<synchronous>, transform_indices = @transform_1, window_bounds = array<i64: 408, 128>}, {pipeline_mode = #tpu.pipeline_mode<synchronous>, transform_indices = @transform_2, window_bounds = array<i64: 1, 128>}, {transform_indices = @transform_3, window_bounds = array<i64: 8, 13>}]} {
    %c0 = arith.constant 0 : index
    %c0_0 = arith.constant 0 : index
    %0 = vector.load %arg1[%c0, %c0_0] : memref<8x408xf32, #tpu.memory_space<vmem>>, vector<8x408xf32>
    %1 = arith.truncf %0 : vector<8x408xf32> to vector<8x408xbf16>
    %c0_1 = arith.constant 0 : index
    %c0_2 = arith.constant 0 : index
    %2 = vector.load %arg2[%c0_1, %c0_2] : memref<408x128xbf16, #tpu.memory_space<vmem>>, vector<408x128xbf16>
    %cst = arith.constant dense<0.000000e+00> : vector<8x128xf32>
    %3 = tpu.matmul %1, %2, %cst {dimension_numbers = #tpu.dot_dimension_numbers<[1], [0], [0], [1], [0, 0, 1, 1], [], []>} : vector<8x408xbf16>, vector<408x128xbf16>, vector<8x128xf32> -> vector<8x128xf32>
    %c0_3 = arith.constant 0 : index
    %c0_4 = arith.constant 0 : index
    %4 = vector.load %arg3[%c0_3, %c0_4] : memref<1x128xf32, #tpu.memory_space<vmem>>, vector<1x128xf32>
    %5 = vector.broadcast %4 : vector<1x128xf32> to vector<8x128xf32>
    %6 = arith.addf %3, %5 : vector<8x128xf32>
    %cst_5 = arith.constant dense<0xFF800000> : vector<8xf32>
    %7 = vector.multi_reduction <maximumf>, %6, %cst_5 [1] : vector<8x128xf32> to vector<8xf32>
    %8 = vector.shape_cast %7 : vector<8xf32> to vector<8x1xf32>
    %9 = vector.broadcast %8 : vector<8x1xf32> to vector<8x128xf32>
    %10 = arith.subf %6, %9 : vector<8x128xf32>
    %11 = math.exp %10 : vector<8x128xf32>
    %cst_6 = arith.constant dense<0.000000e+00> : vector<8xf32>
    %12 = vector.multi_reduction <add>, %11, %cst_6 [1] : vector<8x128xf32> to vector<8xf32>
    %13 = vector.shape_cast %12 : vector<8xf32> to vector<8x1xf32>
    %14 = vector.broadcast %13 : vector<8x1xf32> to vector<8x128xf32>
    %15 = arith.divf %11, %14 : vector<8x128xf32>
    %16 = vector.extract_strided_slice %15 {offsets = [0, 0], sizes = [8, 13], strides = [1, 1]} : vector<8x128xf32> to vector<8x13xf32>
    %c0_7 = arith.constant 0 : index
    %c0_8 = arith.constant 0 : index
    %17 = vector.load %arg4[%c0_7, %c0_8] : memref<8x13xf32, #tpu.memory_space<vmem>>, vector<8x13xf32>
    tpu.vector_store %arg4[%c0_7, %c0_8], %16 {strides = array<i32>} : memref<8x13xf32, #tpu.memory_space<vmem>>, vector<8x13xf32>,
    return
  }
  func.func @transform_0(%arg0: i32) -> (i32, i32) {
    %c0_i32 = arith.constant 0 : i32
    %c0_i32_0 = arith.constant 0 : i32
    return %arg0, %c0_i32 : i32, i32
  }
  func.func @transform_1(%arg0: i32) -> (i32, i32) {
    %c0_i32 = arith.constant 0 : i32
    %c0_i32_0 = arith.constant 0 : i32
    %c0_i32_1 = arith.constant 0 : i32
    return %c0_i32, %c0_i32_0 : i32, i32
  }
  func.func @transform_2(%arg0: i32) -> (i32, i32) {
    %c0_i32 = arith.constant 0 : i32
    %c0_i32_0 = arith.constant 0 : i32
    %c0_i32_1 = arith.constant 0 : i32
    return %c0_i32, %c0_i32_0 : i32, i32
  }
  func.func @transform_3(%arg0: i32) -> (i32, i32) {
    %c0_i32 = arith.constant 0 : i32
    %c0_i32_0 = arith.constant 0 : i32
    return %arg0, %c0_i32 : i32, i32
  }
}

</mosaic_0001>

<bundles_post_ra>
// kernel: classifier_forward.1
= control target key start
LH: loop header
LB: loop body
LE: loop exit
PB: predicated region body
PF: predicated region fallthrough
CT: control target
= control target key end

     0   :  { %8 = vsyncpa [#allocation3], 0  ;;  %s460_s12 = smov [#allocation2]   ;;  %s524_s0 = inlined_call_operand.vmem [shape: f32[8,408], index: 0, kind: input, shape index: {}]   ;;  %s525_s1 = inlined_call_operand.hbm [shape: bf16[408,128], index: 1, kind: input, shape index: {}]   ;;  %s526_s2 = inlined_call_operand.vmem [shape: f32[1,128], index: 2, kind: input, shape index: {}]   ;;  %s527_s3 = inlined_call_operand.vmem [shape: f32[8,13], index: 3, kind: output, shape index: {}]  }
   0x1   :  { %s16_s13 = sshll.u32 %s460_s12, 4  ;;  %s436_s16 = scalar_lea.hbm %s525_s1, 3264  ;;  %s17_s13 = int_to_ptr.vmem [resolvable:$true] %s16_s13 }
   0x2   :  { %p437_p0 = scmp.ne.s32.totalorder %s525_s1, %s436_s16  ;;  %p440_p1 = scmp.lt.u32.totalorder %s436_s16, %s525_s1 }
   0x4   :  { %p442_p2 = pnand %p440_p1, %p437_p0 }
   0x6   :  { %445 = shalt.err (!%p442_p2)
}
   0x7   :  { %s446_s21 = scalar_lea.vmem %s17_s13, 3264  ;;  %p451_p4 = scmp.lt.s32.totalorder %s17_s13, %s17_s13 }
   0x8   :  { %p447_p3 = scmp.ne.s32.totalorder %s17_s13, %s446_s21  ;;  %p452_p5 = scmp.lt.s32.totalorder %s446_s21, %s446_s21 }
   0xa   :  { %p453_p6 = por %p452_p5, %p451_p4 }
   0xc   :  { %p454_p7 = pnand %p453_p6, %p447_p3 }
   0xe   :  { %457 = shalt.err (!%p454_p7)
}
   0xf   :  { %s461_s22 = smov 64   ;;  %s462_s23 = smov 4  }
  0x10   :  { %22 = dma.hbm_to_vmem [thread:$0]  %s525_s1, 3264, %s17_s13, [#allocation3], %s461_s22, %s461_s22, %s462_s23  }
  0x11   :  { %458 = dma.done.wait [#allocation3], 3264  }
  0x12   :  { %459 = vsyncadd [#allocation3], 4294964032  ;;  %v463_v0 = vmov 0   ;;  %v406_v1 = vld [vmem:[#allocation2 + $0x40] sm:$0xff]   ;;  %v409_v4 = vld [vmem:[#allocation2 + $0x48] sm:$0xff]   ;;  %vm248_vm0 = vcmask 195584  }
  0x13   :  { %296 = vmatprep.subr.bf16.mxu1 %v463_v0  ;;  %v407_v2 = vld [vmem:[#allocation2 + $0x80] sm:$0xff]   ;;  %380 = vmatprep.subr.bf16.mxu0 %v406_v1  ;;  %v410_v5 = vld [vmem:[#allocation2 + $0x88] sm:$0xff]   ;;  %v412_v7 = vld [vmem:[#allocation2 + $0x50] sm:$0xff]   ;;  %vm252_vm1 = vcmask 1043456   ;;  %vm345_vm2 = vcmask 105472  }
  0x14   :  { %v408_v3 = vld [vmem:[#allocation2] sm:$0xff]   ;;  %297 = vmatpush1.bf16.msra.mxu1 %v407_v2  ;;  %v411_v6 = vld [vmem:[#allocation2 + $0x8] sm:$0xff]   ;;  %v413_v8 = vld [vmem:[#allocation2 + $0x90] sm:$0xff]  }
  0x15   :  { %381 = vmatpush3.bf16.msra.mxu0 %v408_v3  ;;  %298 = vmatprep.subr.bf16.mxu1 %v463_v0  ;;  %v414_v9 = vld [vmem:[#allocation2 + $0x10] sm:$0xff]   ;;  %v415_v10 = vld [vmem:[#allocation2 + $0x58] sm:$0xff]   ;;  %v418_v13 = vld [vmem:[#allocation2 + $0x60] sm:$0xff]  }
  0x16   :  { %382 = vmatprep.subr.bf16.mxu0 %v409_v4  ;;  %v416_v11 = vld [vmem:[#allocation2 + $0x98] sm:$0xff]   ;;  %v419_v14 = vld [vmem:[#allocation2 + $0xa0] sm:$0xff]   ;;  %v421_v16 = vld [vmem:[#allocation2 + $0x68] sm:$0xff]  }
  0x17   :  { %v417_v12 = vld [vmem:[#allocation2 + $0x18] sm:$0xff]   ;;  %v420_v15 = vld [vmem:[#allocation2 + $0x20] sm:$0xff]   ;;  %v422_v17 = vld [vmem:[#allocation2 + $0xa8] sm:$0xff]  }
  0x18   :  { %299 = vmatpush1.bf16.msra.mxu1 %v410_v5  ;;  %v423_v18 = vld [vmem:[#allocation2 + $0x28] sm:$0xff]   ;;  %v424_v19 = vld [vmem:[#allocation2 + $0x70] sm:$0xff]   ;;  %v427_v23 = vld [vmem:[#allocation2 + $0x78] sm:$0xff]  }
  0x19   :  { %383 = vmatpush3.bf16.msra.mxu0 %v411_v6  ;;  %300 = vmatprep.subr.bf16.mxu1 %v463_v0  ;;  %v425_v20 = vld [vmem:[#allocation2 + $0xb0] sm:$0xff]   ;;  %v30_v22 = vld [vmem:[%s524_s0 + $0x8] sm:$0xff]  ;;  %v32_v25 = vld [vmem:[%s524_s0 + $0x18] sm:$0xff] }
  0x1a   :  { %384 = vmatprep.subr.bf16.mxu0 %v412_v7  ;;  %v426_v21 = vld [vmem:[#allocation2 + $0x30] sm:$0xff]   ;;  %v34_v24 = vpack.c.bf16 %v30_v22, %v30_v22  ;;  %v428_v26 = vld [vmem:[#allocation2 + $0xb8] sm:$0xff]   ;;  %v36_v27 = vpack.c.bf16 %v32_v25, %v32_v25  ;;  %v29_v29 = vld [vmem:[%s524_s0] sm:$0xff] }
  0x1b   :  { %v429_v28 = vld [vmem:[#allocation2 + $0x38] sm:$0xff]   ;;  %v33_v30 = vpack.c.bf16 %v29_v29, %v29_v29  ;;  %v430_v31 = vld [vmem:[#allocation2 + $0xc0] sm:$0xff]   ;;  %v431_v32 = vld [vmem:[#allocation2 + $0xc8] ss:$0 sps:$4 sm:$0xff]  }
  0x1c   :  { %301 = vmatpush1.bf16.msra.mxu1 %v413_v8  ;;  %288 = vmatprep.mubr.bf16.mxu0 %v34_v24  ;;  %v31_v33 = vld [vmem:[%s524_s0 + $0x10] sm:$0xff]  ;;  %v254_v34 = vsel %vm252_vm1, %v431_v32, 0  ;;  %v352_v38 = vld [vmem:[%s526_s2] ss:$0 sm:$0xff] }
  0x1d   :  { %385 = vmatpush3.bf16.msra.mxu0 %v414_v9  ;;  %302 = vmatprep.subr.bf16.mxu1 %v463_v0  ;;  %v35_v35 = vpack.c.bf16 %v31_v33, %v31_v33 }
  0x1e   :  { %386 = vmatprep.subr.bf16.mxu0 %v415_v10  ;;  %379 = vmatprep.mubr.msk.bf16.mxu1 %vm248_vm0, %v36_v27 }
  0x20   :  { %303 = vmatpush1.bf16.msra.mxu1 %v416_v11 }
  0x21   :  { %387 = vmatpush3.bf16.msra.mxu0 %v417_v12  ;;  %304 = vmatprep.subr.bf16.mxu1 %v463_v0 }
  0x22   :  { %388 = vmatprep.subr.bf16.mxu0 %v418_v13 }
  0x24   :  { %305 = vmatpush1.bf16.msra.mxu1 %v419_v14 }
  0x25   :  { %389 = vmatpush3.bf16.msra.mxu0 %v420_v15  ;;  %306 = vmatprep.subr.bf16.mxu1 %v463_v0 }
  0x26   :  { %390 = vmatprep.subr.bf16.mxu0 %v421_v16 }
  0x28   :  { %307 = vmatpush1.bf16.msra.mxu1 %v422_v17 }
  0x29   :  { %391 = vmatpush3.bf16.msra.mxu0 %v423_v18  ;;  %308 = vmatprep.subr.bf16.mxu1 %v463_v0 }
  0x2a   :  { %392 = vmatprep.subr.bf16.mxu0 %v424_v19 }
  0x2c   :  { %309 = vmatpush1.bf16.msra.mxu1 %v425_v20 }
  0x2d   :  { %393 = vmatpush3.bf16.msra.mxu0 %v426_v21  ;;  %310 = vmatprep.subr.bf16.mxu1 %v463_v0 }
  0x2e   :  { %394 = vmatprep.subr.bf16.mxu0 %v427_v23 }
  0x30   :  { %311 = vmatpush1.bf16.msra.mxu1 %v428_v26 }
  0x31   :  { %395 = vmatpush3.bf16.msra.mxu0 %v429_v28  ;;  %312 = vmatprep.subr.bf16.mxu1 %v463_v0 }
  0x34   :  { %289 = vmatmul.mubr.bf16.vlgmr.msra.gmra.mrb[0].mxu0 %v33_v30  ;;  %313 = vmatpush1.bf16.msra.mxu1 %v430_v31 }
  0x35   :  { %314 = vmatprep.subr.bf16.mxu1 %v463_v0 }
  0x38   :  { %315 = vmatpush1.bf16.msra.mxu1 %v254_v34 }
  0x3b   :  { %329 = vmatmul.mubr.bf16.vlgmr.msra.gmra.mrb[0].mxu1 %v35_v35 }
 0x107   :  { %v396_v36 = vpop.f32.mrb[0].mxu0 }
 0x108   :  { %v397_v37 = vpop.f32.mrb[1].mxu0 }
 0x109   :  { %v398_v39 = vadd.f32 %v397_v37, %v396_v36  ;;  %v399_v40 = vpop.f32.mrb[2].mxu0 }
 0x10a   :  { %v400_v41 = vpop.f32.mrb[3].mxu0 }
 0x10b   :  { %v291_v42 = vadd.f32 %v398_v39, %v352_v38 }
 0x10e   :  { %v330_v43 = vpop.f32.mrb[0].mxu1 }
 0x10f   :  { %v331_v44 = vadd.f32 %v330_v43, %v291_v42  ;;  %v332_v45 = vpop.f32.mrb[1].mxu1 }
 0x110   :  { %v333_v46 = vpop.f32.mrb[2].mxu1 }
 0x111   :  { %v334_v47 = vpop.f32.mrb[3].mxu1  ;;  %336 = vmax.xlane.f32.xlu0 %v331_v44 }
 0x19e   :  { %v337_v48 = vpop.xlane.xlu0 %336 }
 0x19f   :  { %v338_v49 = vsub.f32 %v331_v44, %v337_v48 }
 0x1a1   :  { %v339_v50 = vmul.f32 1.442695, %v338_v49 }
 0x1a3   :  { %432 = vpow2.f32 %v339_v50 }
 0x1ad   :  { %v433_v51 = vpop.eup %432 }
 0x1ae   :  { %341 = vadd.xlane.f32.xlu0 %v433_v51 }
 0x23b   :  { %v342_v52 = vpop.xlane.xlu0 %341 }
 0x23c   :  { %434 = vrcp.f32 %v342_v52 }
 0x246   :  { %v435_v53 = vpop.eup %434 }
 0x247   :  { %v344_v54 = vmul.f32 %v435_v53, %v433_v51 }
 0x249   :  { %346 = vst.msk [vmem:[%s527_s3] sm:$0xff] %vm345_vm2, %v344_v54 }
 0x24a   :  { %351 = vsyncpa [#allocation3], 1 }

</bundles_post_ra>
